<compile_context>
chip_gen: v7x
topology: tpu7x:2x2x1
jax: 0.10.0
libtpu: 0.0.40
codegen_flags: <defaults>
</compile_context>

<pallas_src>
import jax
import jax.numpy as jnp
from jax.experimental import pallas as pl
from jax.experimental.pallas import tpu as pltpu


def _interaction_transition_kernel(x_ref, w1_ref, b1_ref, w2_ref, b2_ref, o_ref):
    # x_ref/o_ref: (Bb, C, T) block -- C channels on sublanes, T spatial lanes.
    w1 = w1_ref[...]          # (H, C)  PyTorch (out, in) layout, gamma folded in
    b1 = b1_ref[...]          # (H, 1)  beta folded in
    w2 = w2_ref[...]          # (C, H)
    b2 = b2_ref[...]          # (C, 1)

    # Bb is a small static block dim -> trace-time unroll; every iteration is
    # pure 2D (C, T) work so no batched-dot relayouts are ever needed.
    for b in range(x_ref.shape[0]):
        x = x_ref[b].astype(jnp.float32)                   # (C, T)

        # LayerNorm over the channel (sublane) axis; biased variance, eps=1e-5
        # (PyTorch nn.LayerNorm defaults).  Affine is folded into w1/b1.
        mean = jnp.mean(x, axis=0, keepdims=True)          # (1, T)
        d = x - mean
        var = jnp.mean(d * d, axis=0, keepdims=True)       # (1, T)
        xhat = d * jax.lax.rsqrt(var + 1e-5)               # (C, T)

        # Linear1 (C -> H) + bias + ReLU.  w1 is (H, C): contract over C, no
        # activation transpose.
        h = jnp.dot(w1, xhat, preferred_element_type=jnp.float32)   # (H, T)
        h = jnp.maximum(h + b1, 0.0)

        # Linear2 (H -> C) + bias.
        out = jnp.dot(w2, h, preferred_element_type=jnp.float32)    # (C, T)
        out = out + b2

        o_ref[b] = out.astype(o_ref.dtype)


def _vmem_limit_bytes():
    """Generation-aware scoped-VMEM limit (<=48 MiB on v7x, up to 96 MiB on v5e/v6e)."""
    try:
        cap = pltpu.get_tpu_info().vmem_capacity_bytes
    except Exception:
        cap = 64 << 20                      # conservative fallback (v7x-sized)
    return int(min(cap * 3 // 4, 96 << 20))


def _pick_blocking(B, C, H, n_pad, budget_bytes, lane_cap=65536):
    """Choose (b_blk, tile_n, n_steps, n_pad2) so each grid step moves ~budget bytes."""
    # f32 VMEM bytes per lane column per folded batch row:
    #   in + out (double buffered) = 16*C, temps x/d/xhat/out = 16*C, hidden = 4*H.
    per_col = 4 * (8 * C + H) + 16
    target_cols = max(128, budget_bytes // max(per_col, 1))

    # Spatial split: fewest steps with tile <= lane_cap and <= target, evenly
    # sized multiples of 128 -> padding waste < 128 columns per step.
    cap = max(128, (min(lane_cap, target_cols) // 128) * 128)
    n_steps = pl.cdiv(n_pad, cap)
    tile_n = pl.cdiv(pl.cdiv(n_pad, n_steps), 128) * 128
    n_pad2 = n_steps * tile_n

    # Fold batches into the block when one spatial step is far below target.
    b_blk = 1
    if n_steps == 1:
        b_desired = int(min(B, max(1, target_cols // tile_n), 8))
        for d in range(b_desired, 0, -1):
            if B % d == 0:
                b_blk = d
                break

    # v7x has 2 TensorCores: guarantee >= 2 parallel grid steps when possible.
    if (B // b_blk) * n_steps < 2:
        if B >= 2:
            for d in range(min(b_blk, max(1, B // 2)), 0, -1):
                if B % d == 0 and B // d >= 2:
                    b_blk = d
                    break
        elif n_pad >= 256:
            n_steps = 2
            tile_n = pl.cdiv(pl.cdiv(n_pad, 2), 128) * 128
            n_pad2 = 2 * tile_n

    return b_blk, tile_n, n_steps, n_pad2


def interaction_transition(x, gamma, beta, w1, b1, w2, b2):
    """InteractionTransition forward pass.

    x:     (B, C, S, S) float32
    gamma: (C,),  beta: (C,)      -- nn.LayerNorm(C) affine params
    w1:    (H, C), b1: (H,)       -- nn.Linear(C, H), PyTorch (out, in) layout
    w2:    (C, H), b2: (C,)       -- nn.Linear(H, C), PyTorch (out, in) layout
    Returns (B, C, S, S).
    """
    B, C, S, _ = x.shape
    H = w1.shape[0]
    N = S * S

    # Fold LayerNorm affine into Linear1 (numerically equivalent up to f32 rounding).
    w1f = (w1 * gamma[None, :]).astype(jnp.float32)          # (H, C)
    b1f = (w1.astype(jnp.float32) @ beta.astype(jnp.float32)
           + b1.astype(jnp.float32))                         # (H,)

    vmem_limit = _vmem_limit_bytes()
    b_blk, tile_n, n_steps, n_pad2 = _pick_blocking(
        B, C, H, pl.cdiv(N, 128) * 128, budget_bytes=vmem_limit // 2)

    # Contiguous reshape: free, unlike a permute.
    x3 = x.reshape(B, C, N)
    if n_pad2 != N:
        # Per-position LayerNorm -> zero-padded columns never contaminate real
        # ones; they are sliced away below.
        # TODO(synk): for ragged N, masked tail stores would avoid this extra pad/slice HBM pass.
        x3 = jnp.pad(x3, ((0, 0), (0, 0), (0, n_pad2 - N)))

    grid = (B // b_blk, n_steps)

    # Keep params 2D (channels on sublanes) so each block equals the full array.
    b1_2 = b1f.reshape(H, 1)
    b2_2 = b2.astype(jnp.float32).reshape(C, 1)
    w2f = w2.astype(jnp.float32)

    # Grid-invariant operands: constant index map -> fetched once, never re-DMA'd.
    const = lambda ib, it: (0, 0)

    out3 = pl.pallas_call(
        _interaction_transition_kernel,
        out_shape=jax.ShapeDtypeStruct((B, C, n_pad2), x.dtype),
        grid_spec=pltpu.PrefetchScalarGridSpec(
            num_scalar_prefetch=0,
            grid=grid,
            in_specs=[
                pl.BlockSpec((b_blk, C, tile_n), lambda ib, it: (ib, 0, it)),  # x
                pl.BlockSpec((H, C), const),                                   # w1 (gamma folded)
                pl.BlockSpec((H, 1), const),                                   # b1 (beta folded)
                pl.BlockSpec((C, H), const),                                   # w2
                pl.BlockSpec((C, 1), const),                                   # b2
            ],
            out_specs=pl.BlockSpec((b_blk, C, tile_n), lambda ib, it: (ib, 0, it)),
        ),
        compiler_params=pltpu.CompilerParams(
            dimension_semantics=("parallel", "parallel"),
            vmem_limit_bytes=vmem_limit,
        ),
    )(x3, w1f, b1_2, w2f, b2_2)

    if n_pad2 != N:
        out3 = out3[:, :, :N]
    return out3.reshape(B, C, S, S)


def _reference(x, gamma, beta, w1, b1, w2, b2):
    """Pure-JAX reference mirroring the PyTorch forward (weights in (out, in) layout)."""
    xc = jnp.transpose(x, (0, 2, 3, 1)).astype(jnp.float32)
    mean = jnp.mean(xc, axis=-1, keepdims=True)
    var = jnp.mean((xc - mean) ** 2, axis=-1, keepdims=True)
    xn = (xc - mean) / jnp.sqrt(var + 1e-5) * gamma + beta
    h = jnp.maximum(xn @ w1.T + b1, 0.0)
    out = h @ w2.T + b2
    return jnp.transpose(out, (0, 3, 1, 2))


if __name__ == "__main__":
    # Small shapes consistent with the module: (batch, c_i, seq_len, seq_len).
    B, C, S = 2, 4, 16
    factor = 4
    H = C * factor

    key = jax.random.PRNGKey(0)
    kx, kg, kb, kw1, kb1, kw2, kb2 = jax.random.split(key, 7)

    x = jax.random.normal(kx, (B, C, S, S), dtype=jnp.float32)

    # Deterministic synthetic parameters (shapes match nn.LayerNorm(c_i),
    # nn.Linear(c_i, c_i*factor), nn.Linear(c_i*factor, c_i); Linear weights
    # kept in PyTorch's (out, in) layout).
    gamma = 1.0 + 0.1 * jax.random.normal(kg, (C,), dtype=jnp.float32)
    beta = 0.1 * jax.random.normal(kb, (C,), dtype=jnp.float32)
    w1 = jax.random.normal(kw1, (H, C), dtype=jnp.float32) / jnp.sqrt(C)
    b1 = 0.1 * jax.random.normal(kb1, (H,), dtype=jnp.float32)
    w2 = jax.random.normal(kw2, (C, H), dtype=jnp.float32) / jnp.sqrt(H)
    b2 = 0.1 * jax.random.normal(kb2, (C,), dtype=jnp.float32)

    out = interaction_transition(x, gamma, beta, w1, b1, w2, b2)
    out = jax.block_until_ready(out)

    ref = _reference(x, gamma, beta, w1, b1, w2, b2)
    assert out.shape == (B, C, S, S)
    assert jnp.allclose(out, ref, atol=1e-5, rtol=1e-5), "mismatch vs reference"

    print("KERNEL_OK")
</pallas_src>

<mosaic_0001>
module attributes {stable_mosaic.version = 11 : i64} {
  func.func @_interaction_transition_kernel(%arg0: i32, %arg1: i32, %arg2: memref<1x4x256xf32, #tpu.memory_space<vmem>>, %arg3: memref<16x4xf32, #tpu.memory_space<vmem>>, %arg4: memref<16x1xf32, #tpu.memory_space<vmem>>, %arg5: memref<4x16xf32, #tpu.memory_space<vmem>>, %arg6: memref<4x1xf32, #tpu.memory_space<vmem>>, %arg7: memref<1x4x256xf32, #tpu.memory_space<vmem>>) attributes {dimension_semantics = [#tpu.dimension_semantics<parallel>, #tpu.dimension_semantics<parallel>], iteration_bounds = array<i64: 2, 1>, scalar_prefetch = 0 : i64, scratch_operands = 0 : i64, tpu.core_type = #tpu.core_type<tc>, window_params = [{transform_indices = @transform_0, window_bounds = array<i64: 1, 4, 256>}, {pipeline_mode = #tpu.pipeline_mode<synchronous>, transform_indices = @transform_1, window_bounds = array<i64: 16, 4>}, {pipeline_mode = #tpu.pipeline_mode<synchronous>, transform_indices = @transform_2, window_bounds = array<i64: 16, 1>}, {pipeline_mode = #tpu.pipeline_mode<synchronous>, transform_indices = @transform_3, window_bounds = array<i64: 4, 16>}, {pipeline_mode = #tpu.pipeline_mode<synchronous>, transform_indices = @transform_4, window_bounds = array<i64: 4, 1>}, {transform_indices = @transform_5, window_bounds = array<i64: 1, 4, 256>}]} {
    %c0 = arith.constant 0 : index
    %c0_0 = arith.constant 0 : index
    %0 = vector.load %arg3[%c0, %c0_0] : memref<16x4xf32, #tpu.memory_space<vmem>>, vector<16x4xf32>
    %c0_1 = arith.constant 0 : index
    %c0_2 = arith.constant 0 : index
    %1 = vector.load %arg4[%c0_1, %c0_2] : memref<16x1xf32, #tpu.memory_space<vmem>>, vector<16x1xf32>
    %c0_3 = arith.constant 0 : index
    %c0_4 = arith.constant 0 : index
    %2 = vector.load %arg5[%c0_3, %c0_4] : memref<4x16xf32, #tpu.memory_space<vmem>>, vector<4x16xf32>
    %c0_5 = arith.constant 0 : index
    %c0_6 = arith.constant 0 : index
    %3 = vector.load %arg6[%c0_5, %c0_6] : memref<4x1xf32, #tpu.memory_space<vmem>>, vector<4x1xf32>
    %c0_7 = arith.constant 0 : index
    %c0_8 = arith.constant 0 : index
    %c0_9 = arith.constant 0 : index
    %4 = vector.load %arg2[%c0_7, %c0_8, %c0_9] : memref<1x4x256xf32, #tpu.memory_space<vmem>>, vector<1x4x256xf32>
    %5 = vector.shape_cast %4 : vector<1x4x256xf32> to vector<4x256xf32>
    %cst = arith.constant dense<0.000000e+00> : vector<256xf32>
    %6 = vector.multi_reduction <add>, %5, %cst [0] : vector<4x256xf32> to vector<256xf32>
    %7 = vector.shape_cast %6 : vector<256xf32> to vector<1x256xf32>
    %cst_10 = arith.constant 4.000000e+00 : f32
    %8 = vector.broadcast %cst_10 : f32 to vector<1x256xf32>
    %9 = arith.divf %7, %8 : vector<1x256xf32>
    %10 = vector.broadcast %9 : vector<1x256xf32> to vector<4x256xf32>
    %11 = arith.subf %5, %10 : vector<4x256xf32>
    %12 = arith.mulf %11, %11 : vector<4x256xf32>
    %cst_11 = arith.constant dense<0.000000e+00> : vector<256xf32>
    %13 = vector.multi_reduction <add>, %12, %cst_11 [0] : vector<4x256xf32> to vector<256xf32>
    %14 = vector.shape_cast %13 : vector<256xf32> to vector<1x256xf32>
    %cst_12 = arith.constant 4.000000e+00 : f32
    %15 = vector.broadcast %cst_12 : f32 to vector<1x256xf32>
    %16 = arith.divf %14, %15 : vector<1x256xf32>
    %cst_13 = arith.constant 9.99999974E-6 : f32
    %17 = vector.broadcast %cst_13 : f32 to vector<1x256xf32>
    %18 = arith.addf %16, %17 : vector<1x256xf32>
    %19 = math.rsqrt %18 : vector<1x256xf32>
    %20 = vector.broadcast %19 : vector<1x256xf32> to vector<4x256xf32>
    %21 = arith.mulf %11, %20 : vector<4x256xf32>
    %cst_14 = arith.constant dense<0.000000e+00> : vector<16x256xf32>
    %22 = tpu.matmul %0, %21, %cst_14 {dimension_numbers = #tpu.dot_dimension_numbers<[1], [0], [0], [1], [0, 0, 1, 1], [], []>} : vector<16x4xf32>, vector<4x256xf32>, vector<16x256xf32> -> vector<16x256xf32>
    %23 = vector.broadcast %1 : vector<16x1xf32> to vector<16x256xf32>
    %24 = arith.addf %22, %23 : vector<16x256xf32>
    %cst_15 = arith.constant 0.000000e+00 : f32
    %25 = vector.broadcast %cst_15 : f32 to vector<16x256xf32>
    %26 = arith.maximumf %24, %25 : vector<16x256xf32>
    %cst_16 = arith.constant dense<0.000000e+00> : vector<4x256xf32>
    %27 = tpu.matmul %2, %26, %cst_16 {dimension_numbers = #tpu.dot_dimension_numbers<[1], [0], [0], [1], [0, 0, 1, 1], [], []>} : vector<4x16xf32>, vector<16x256xf32>, vector<4x256xf32> -> vector<4x256xf32>
    %28 = vector.broadcast %3 : vector<4x1xf32> to vector<4x256xf32>
    %29 = arith.addf %27, %28 : vector<4x256xf32>
    %c0_17 = arith.constant 0 : index
    %c0_18 = arith.constant 0 : index
    %c0_19 = arith.constant 0 : index
    %30 = vector.load %arg7[%c0_17, %c0_18, %c0_19] : memref<1x4x256xf32, #tpu.memory_space<vmem>>, vector<1x4x256xf32>
    %31 = vector.shape_cast %30 : vector<1x4x256xf32> to vector<4x256xf32>
    %32 = vector.shape_cast %29 : vector<4x256xf32> to vector<1x4x256xf32>
    tpu.vector_store %arg7[%c0_17, %c0_18, %c0_19], %32 {strides = array<i32>} : memref<1x4x256xf32, #tpu.memory_space<vmem>>, vector<1x4x256xf32>,
    return
  }
  func.func @transform_0(%arg0: i32, %arg1: i32) -> (i32, i32, i32) {
    %c0_i32 = arith.constant 0 : i32
    %c0_i32_0 = arith.constant 0 : i32
    return %arg0, %c0_i32, %arg1 : i32, i32, i32
  }
  func.func @transform_1(%arg0: i32, %arg1: i32) -> (i32, i32) {
    %c0_i32 = arith.constant 0 : i32
    %c0_i32_0 = arith.constant 0 : i32
    %c0_i32_1 = arith.constant 0 : i32
    return %c0_i32, %c0_i32_0 : i32, i32
  }
  func.func @transform_2(%arg0: i32, %arg1: i32) -> (i32, i32) {
    %c0_i32 = arith.constant 0 : i32
    %c0_i32_0 = arith.constant 0 : i32
    %c0_i32_1 = arith.constant 0 : i32
    return %c0_i32, %c0_i32_0 : i32, i32
  }
  func.func @transform_3(%arg0: i32, %arg1: i32) -> (i32, i32) {
    %c0_i32 = arith.constant 0 : i32
    %c0_i32_0 = arith.constant 0 : i32
    %c0_i32_1 = arith.constant 0 : i32
    return %c0_i32, %c0_i32_0 : i32, i32
  }
  func.func @transform_4(%arg0: i32, %arg1: i32) -> (i32, i32) {
    %c0_i32 = arith.constant 0 : i32
    %c0_i32_0 = arith.constant 0 : i32
    %c0_i32_1 = arith.constant 0 : i32
    return %c0_i32, %c0_i32_0 : i32, i32
  }
  func.func @transform_5(%arg0: i32, %arg1: i32) -> (i32, i32, i32) {
    %c0_i32 = arith.constant 0 : i32
    %c0_i32_0 = arith.constant 0 : i32
    return %arg0, %c0_i32, %arg1 : i32, i32, i32
  }
}

</mosaic_0001>

<bundles_post_ra>
// kernel: tpu_custom_call.1
= control target key start
LH: loop header
LB: loop body
LE: loop exit
PB: predicated region body
PF: predicated region fallthrough
CT: control target
= control target key end

     0   :  { %10 = vsyncpa [#allocation3], 0  ;;  %s938_s0 = inlined_call_operand.vmem [shape: f32[2,4,256], index: 0, kind: input, shape index: {}]   ;;  %s939_s1 = inlined_call_operand.vmem [shape: f32[16,4], index: 1, kind: input, shape index: {}]   ;;  %s940_s2 = inlined_call_operand.vmem [shape: f32[16,1], index: 2, kind: input, shape index: {}]   ;;  %s941_s3 = inlined_call_operand.vmem [shape: f32[4,16], index: 3, kind: input, shape index: {}]   ;;  %s942_s4 = inlined_call_operand.vmem [shape: f32[4,1], index: 4, kind: input, shape index: {}]   ;;  %s943_s5 = inlined_call_operand.hbm [shape: f32[2,4,256], index: 5, kind: output, shape index: {}]  }
   0x1   :  { %12 = vsyncpa [#allocation3 + $0x1], 0  ;;  %s799_s18 = smov 0   ;;  %s801_s19 = smov 0  }
   0x2   :  { %s803_s20 = smov 0   ;;  %s805_s21 = smov 0  }
   0x3   :  { %s807_s22 = smov 0   ;;  %s809_s23 = smov 0  }
   0x4 LB: > { %s598_s24 = sadd.s32 4294967295, %s764_s23   ;;  %s599_s25 = sadd.s32 4294967294, %s764_s23   ;;  %s764_s23 = sphi %s809_s23, %s18_s23   ;;  %s760_s22 = sphi %s807_s22, %s950_s22   ;;  %s756_s21 = sphi %s805_s21, %s949_s21   ;;  %s752_s20 = sphi %s803_s20, %s948_s20   ;;  %s748_s19 = sphi %s801_s19, %s947_s19   ;;  %s744_s18 = sphi %s799_s18, %s946_s18  }
   0x5   : > { %s30_s26 = sadd.s32 1, %s760_s22  ;;  %s151_s27 = sadd.s32 1, %s752_s20 }
   0x6   : > { %p32_p0 = scmp.ge.s32.totalorder %s30_s26, 2  ;;  %p161_p1 = scmp.ne.s32.totalorder %s752_s20, %s748_s19 }
   0x7   : > { %p162_p2 = scmp.eq.s32.totalorder %s598_s24, 1  ;;  %p167_p3 = scmp.ne.s32.totalorder %s748_s19, %s744_s18 }
   0x8   : > { %s952_s26 = smov (%p32_p0, %s30_s26), 0  ;;  %p168_p5 = scmp.eq.s32.totalorder %s599_s25, 1 }
   0x9   : > { %p839_p4 = por %p162_p2, %p161_p1  ;;  %s146_s29 = ssub.s32 %s760_s22, %s952_s26 }
   0xa   : > { %p602_p6 = scmp.ge.s32.totalorder %s764_s23, 1  ;;  %p149_p7 = scmp.eq.s32.totalorder %s146_s29, 0 }
   0xb   : > { %p846_p8 = por %p168_p5, %p167_p3  ;;  %p211_p9 = scmp.lt.s32.totalorder %s764_s23, 3 }
   0xc   : > { %s852_s6 = scalar_select %p149_p7, %s752_s20, %s151_s27  }
   0xd   : > { %p212_p10 = pnand %p602_p6, %p211_p9 }
   0xe   : > { %p244_p11 = scmp.lt.s32.totalorder (!%p212_p10), %s756_s21, 1  ;;  %v766_v0 = vmov (!%p212_p10), 0.0   ;;  %v256_v1 = vld [vmem:[%s940_s2] sm:$0xff] (!%p212_p10)  ;;  %v767_v2 = vmov (!%p212_p10), 0   ;;  %vm264_vm0 = vcmask (!%p212_p10), 1043456   ;;  %v257_v3 = vld [vmem:[%s940_s2 + $0x8] sm:$0xff] (!%p212_p10) }
   0xf   : > { %215 = sbr.rel (%p212_p10) target bundleno = 546 (0x222), region = 40  ;;  %403 = vmatprep.mubr.f32.mxu0 (!%p212_p10), %v766_v0  ;;  %493 = vmatprep.mubr.f32.mxu1 (!%p212_p10), %v766_v0  ;;  %v254_v49 = vld [vmem:[%s939_s1] sm:$0xff] (!%p212_p10)  ;;  %vm328_vm1 = vcmask (!%p212_p10), 31744   ;;  %v255_v50 = vld [vmem:[%s939_s1 + $0x8] sm:$0xff] (!%p212_p10)  ;;  %vm425_vm2 = vcmask (!%p212_p10), 130048   ;;  %s617_s11 = sshll.u32 (!%p212_p10), %s756_s21, 7 }
  0x10   : > { %679 = vset.pattern.permute.xlu0 (!%p212_p10), %v767_v2  ;;  %680 = vset.pattern.permute.xlu1 (!%p212_p10), %v767_v2  ;;  %v259_v51 = vld [vmem:[%s942_s4] sm:$0xf] (!%p212_p10)  ;;  %s891_s16 = scalar_lea.hbm (!%p212_p10), %s943_s5, %s617_s11 }
  0x11   : > { %318 = vperm.xlu0 (!%p212_p10), %679, %v256_v1   ;;  %422 = vperm.xlu1 (!%p212_p10), %680, %v259_v51  }
  0x15   : > { %323 = vperm.xlu0 (!%p212_p10), %679, %v257_v3  }
  0x16   : > { %s245_s9 = scalar_select %p244_p11, %s756_s21, 1 }
  0x17   : > { %s768_s21 = smov [#allocation2]  }
  0x18   : > { %s616_s10 = sshll.u32 %s245_s9, 3  ;;  %s240_s9 = sand.u32 1, %s748_s19  }
  0x19   : > { %s251_s15 = scalar_lea.vmem %s938_s0, %s616_s10  ;;  %s603_s10 = sshll.u32 %s240_s9, 3 }
  0x1a   : > { %v260_v4 = vld [vmem:[%s251_s15] sm:$0xff]  ;;  %s242_s12 = scalar_lea.vmem [#allocation2], %s603_s10  ;;  %s506_s17 = scalar_lea.sflag [#allocation3], %s240_s9 }
  0x1b   : > { %v262_v5 = vcombine.high %v260_v4, %v260_v4  ;;  %v265_v6 = vsel %vm264_vm0, %v260_v4, 0.0  ;;  %s522_s13 = sshll.u32 %s242_s12, 4  ;;  %s690_s25 = sshll.u32 %s768_s21, 4  ;;  %s893_s13 = int_to_ptr.vmem [resolvable:$true] %s522_s13  ;;  %s691_s25 = int_to_ptr.vmem [resolvable:$false] %s690_s25 }
  0x1c   : > { %v266_v7 = vrot.slane %v265_v6, 4  ;;  %s686_s24 = scalar_lea.vmem %s893_s13, 128  ;;  %s692_s27 = scalar_lea.vmem %s691_s25, 256 }
  0x1d   : > { %v272_v8 = vsel %vm264_vm0, %v262_v5, 0.0  ;;  %p687_p12 = scmp.ne.s32.totalorder %s893_s13, %s686_s24  ;;  %p693_p1 = scmp.lt.s32.totalorder %s893_s13, %s691_s25 }
  0x1e   : > { %v267_v9 = vadd.f32 %v266_v7, %v265_v6  ;;  %v273_v10 = vrot.slane %v272_v8, 4  ;;  %p694_p2 = scmp.lt.s32.totalorder %s692_s27, %s686_s24 }
  0x1f   : > { %p688_p13 = pnand %p687_p12, %p839_p4 }
  0x20   : > { %v268_v11 = vrot.slane %v267_v9, 2  ;;  %v274_v12 = vadd.f32 %v273_v10, %v272_v8  ;;  %p695_p3 = por %p694_p2, %p693_p1 }
  0x21   : > { %p689_p0 = pneg %p688_p13 }
  0x22   : > { %v269_v13 = vadd.f32 %v268_v11, %v267_v9  ;;  %v275_v14 = vrot.slane %v274_v12, 2 }
  0x23   : > { %p696_p5 = pnand %p695_p3, %p689_p0 }
  0x24   : > { %v270_v15 = vrot.slane %v269_v13, 1  ;;  %v276_v16 = vadd.f32 %v275_v14, %v274_v12 }
  0x26   : > { %v271_v17 = vadd.f32 %v270_v15, %v269_v13  ;;  %v277_v18 = vrot.slane %v276_v16, 1 }
  0x28   : > { %v278_v19 = vadd.f32 %v277_v18, %v276_v16  ;;  %v280_v20 = vmul.f32 0.25, %v271_v17 }
  0x2a   : > { %v281_v21 = vmul.f32 0.25, %v278_v19 }
  0x2c   : > { %v284_v22 = vcombine.low %v280_v20, %v281_v21 }
  0x2e   : > { %v286_v23 = vsub.f32 %v260_v4, %v284_v22  ;;  %v258_v4 = vld [vmem:[%s941_s3] sm:$0xf] }
  0x30   : > { %v287_v24 = vmul.f32 %v286_v23, %v286_v23 }
  0x32   : > { %v289_v25 = vcombine.high %v287_v24, %v287_v24  ;;  %v291_v26 = vsel %vm264_vm0, %v287_v24, 0.0 }
  0x33   : > { %v292_v27 = vrot.slane %v291_v26, 4 }
  0x34   : > { %v298_v28 = vsel %vm264_vm0, %v289_v25, 0.0 }
  0x35   : > { %v293_v29 = vadd.f32 %v292_v27, %v291_v26  ;;  %v299_v30 = vrot.slane %v298_v28, 4 }
  0x37   : > { %v294_v31 = vrot.slane %v293_v29, 2  ;;  %v300_v32 = vadd.f32 %v299_v30, %v298_v28 }
  0x39   : > { %v295_v33 = vadd.f32 %v294_v31, %v293_v29  ;;  %v301_v34 = vrot.slane %v300_v32, 2 }
  0x3b   : > { %v296_v35 = vrot.slane %v295_v33, 1  ;;  %v302_v36 = vadd.f32 %v301_v34, %v300_v32 }
  0x3d   : > { %v297_v37 = vadd.f32 %v296_v35, %v295_v33  ;;  %v303_v38 = vrot.slane %v302_v36, 1 }
  0x3f   : > { %v304_v39 = vadd.f32 %v303_v38, %v302_v36  ;;  %v305_v40 = vmul.f32 0.25, %v297_v37 }
  0x41   : > { %v306_v41 = vmul.f32 0.25, %v304_v39  ;;  %v307_v42 = vadd.f32 1e-05, %v305_v40 }
  0x43   : > { %v308_v43 = vadd.f32 1e-05, %v306_v41  ;;  %682 = vrsqrt.f32 %v307_v42 }
  0x45   : > { %684 = vrsqrt.f32 %v308_v43 }
  0x4d   : > { %v683_v44 = vpop.eup %682 }
  0x4f   : > { %v685_v45 = vpop.eup %684 }
  0x50   : > { %v313_v46 = vcombine.low %v683_v44, %v685_v45 }
  0x52   : > { %v315_v47 = vmul.f32 %v313_v46, %v286_v23 }
  0x54   : > { %v327_v48 = vcombine.high %v315_v47, %v315_v47 }
  0x56   : > { %606 = vmatprep.subr.msk.mxu0 %vm264_vm0, %v327_v48 }
  0x57   : > { %607 = vmatpush1.msk.msra.mxu0 %vm264_vm0, %v315_v47 }
  0x58   : > { %608 = vmatmul.mubr.msk.f32.vlgmr.msra.gmra.mrb[0].mxu0 %vm328_vm1, %v254_v49 }
  0x59   : > { %409 = vmatprep.mubr.f32.mxu0 %v766_v0 }
  0x5c   : > { %609 = vmatmul.mubr.msk.f32.gmra.mrb[2].mxu0 %vm328_vm1, %v255_v50 }
  0x90   : > { %v319_v52 = vpop.permute.xlu0 %318  ;;  %v423_v5 = vpop.permute.xlu1 %422 }
  0x94   : > { %v324_v56 = vpop.permute.xlu0 %323 }
 0x12b   : > { %v405_v53 = vpop.f32.mrb[0].mxu0 }
 0x12c   : > { %v407_v54 = vpop.f32.mrb[1].mxu0  ;;  %v406_v55 = vadd.f32 %v405_v53, %v319_v52 }
 0x12d   : > { %v408_v57 = vadd.f32 %v407_v54, %v319_v52 }
 0x12e   : > { %v416_v62 = vmax.f32 %v406_v55, 0.0 }
 0x12f   : > { %v411_v58 = vpop.f32.mrb[2].mxu0  ;;  %v417_v0 = vmax.f32 %v408_v57, 0.0 }
 0x130   : > { %v412_v59 = vadd.f32 %v411_v58, %v324_v56  ;;  %v413_v60 = vpop.f32.mrb[3].mxu0 }
 0x131   : > { %v414_v61 = vadd.f32 %v413_v60, %v324_v56 }
 0x132   : > { %v418_v63 = vmax.f32 %v412_v59, 0.0 }
 0x133   : > { %v419_v1 = vmax.f32 %v414_v61, 0.0 }
 0x134   : > { %v620_v2 = vpack.c.bf16 %v418_v63, %v416_v62 }
 0x135   : > { %v618_v3 = vpack.c.bf16 %v419_v1, %v417_v0 }
 0x137   : > { %619 = vmatprep.subr.bf16.mxu1 %v618_v3 }
 0x138   : > { %621 = vmatpush1.bf16.msra.mxu1 %v620_v2 }
 0x13b   : > { %610 = vmatmul.mubr.msk.f32.vlgmr.msra.gmra.mrb[0].mxu1 %vm425_vm2, %v258_v4 }
 0x20e   : > { %v495_v6 = vpop.f32.mrb[0].mxu1 }
 0x20f   : > { %v496_v7 = vadd.f32 %v495_v6, %v423_v5  ;;  %v497_v8 = vpop.f32.mrb[1].mxu1 }
 0x210   : > { %v498_v9 = vadd.f32 %v497_v8, %v423_v5 }
 0x212   : > { %v502_v10 = vcombine.low %v496_v7, %v498_v9 }
 0x214   : > { %504 = vst [vmem:[%s242_s12] sm:$0xff] %v502_v10 }
 0x215   : > { %699 = shalt.err (!%p696_p5)
}
 0x216   : > { %s700_s29 = scalar_lea.hbm %s891_s16, 128  ;;  %s704_s9 = scalar_lea.hbm %s943_s5, 256 }
 0x217   : > { %p701_p6 = scmp.ne.s32.totalorder %s891_s16, %s700_s29  ;;  %p705_p10 = scmp.lt.u32.totalorder %s891_s16, %s943_s5 }
 0x218   : > { %p706_p11 = scmp.lt.u32.totalorder %s704_s9, %s700_s29  ;;  %p708_p13 = scmp.lt.u32.totalorder %s700_s29, %s891_s16 }
 0x219   : > { %p702_p7 = pnand %p701_p6, %p839_p4 }
 0x21a   : > { %p707_p12 = por %p706_p11, %p705_p10 }
 0x21b   : > { %p703_p9 = pneg %p702_p7 }
 0x21c   : > { %p709_p0 = por %p708_p13, %p707_p12 }
 0x21e   : > { %p710_p1 = pnand %p709_p0, %p703_p9 }
 0x220   : > { %713 = shalt.err (!%p710_p1)
}
 0x221   : > { %622 = dma.vmem_to_hbm [thread:$0]  (%p839_p4), %s893_s13, 128, %s891_s16, %s506_s17  }
 0x222 PF: > { %p628_p2 = scmp.ge.s32.totalorder %s764_s23, 2  ;;  %s534_s12 = sand.u32 1, %s744_s18  }
 0x223   : > { %s535_s14 = scalar_lea.sflag [#allocation3], %s534_s12 }
 0x224   : > { %p625_p3 = pnand %p628_p2, %p846_p8 }
 0x226   : > { %739 = dma.done.wait (!%p625_p3), %s535_s14, 128  }
 0x227   : > { %741 = vsyncadd (!%p625_p3), %s535_s14, 4294967168  ;;  %s18_s23 = sadd.s32 1, %s764_s23   ;;  %s946_s18 = smov %s748_s19 }
 0x228   : > { %p15_p5 = scmp.ge.s32.totalorder %s18_s23, 4   ;;  %s947_s19 = smov %s752_s20 }
 0x229   : > { %s948_s20 = smov %s852_s6  ;;  %s949_s21 = smov %s760_s22 }
 0x22a   : > { %s950_s22 = smov %s952_s26  ;;  %17 = sbr.rel (!%p15_p5) target bundleno = 4 (0x4), region = 75 }
 0x231   :  { %540 = vsyncpa [#allocation3], 1 }
 0x232   :  { %542 = vsyncpa [#allocation3 + $0x1], 1 }

</bundles_post_ra>
